<compile_context>
chip_gen: v7x
topology: tpu7x:2x2x1
jax: 0.10.0
libtpu: 0.0.40
codegen_flags: <defaults>
</compile_context>

<pallas_src>
import functools

import jax
import jax.numpy as jnp
from jax.experimental import pallas as pl
from jax.experimental.pallas import tpu as pltpu


def _round_up(x: int, m: int) -> int:
    return (x + m - 1) // m * m


def _cdiv(a: int, b: int) -> int:
    return -(-a // b)


def _fused_mlp_kernel(x_ref, *refs, num_layers: int):
    """refs = (w0, b0, w1, b1, ..., w_{L-1}, b_{L-1}, o_ref)."""
    o_ref = refs[-1]
    h = x_ref[...]
    for i in range(num_layers):
        w = refs[2 * i][...]
        b = refs[2 * i + 1][...]
        # MXU matmul with f32 accumulation; bias + ReLU on the f32 accumulator.
        h = jnp.dot(h, w, preferred_element_type=jnp.float32) + b
        if i != num_layers - 1:
            h = jnp.maximum(h, 0.0)
    o_ref[...] = h.astype(o_ref.dtype)


def qnetwork_forward(x, padded_params, action_size, *, block_batch: int = 2048,
                     min_rows_for_core_split: int = 256):
    """Fused QNetwork forward: ReLU on all but the last layer.

    x:              [batch, state_size] float32
    padded_params:  list of (w_pad [din(_pad), dout_pad], b_pad [1, dout_pad]);
                    layer 0 has din == state_size (unpadded), all dout padded
                    to multiples of 128, layers >= 1 have din padded too.
    Returns:        [batch, action_size] float32
    """
    batch, state_size = x.shape
    num_layers = len(padded_params)
    dout_pad_last = padded_params[-1][0].shape[1]

    if batch == 0:  # degenerate case: no pallas_call with an empty grid
        return jnp.zeros((0, action_size), x.dtype)

    assert padded_params[0][0].shape[0] == state_size, (
        "layer-0 weight must keep din == state_size (unpadded)")

    # ---- batch tiling: balance tiles to minimize padding; keep >=2 tiles
    # for large batches so v7x's two TensorCores both get work. ----
    num_tiles = max(1, _cdiv(batch, block_batch))
    if num_tiles == 1 and batch >= 2 * min_rows_for_core_split:
        num_tiles = 2
    tb = _round_up(_cdiv(batch, num_tiles), 8)
    b_pad = tb * num_tiles

    # Zero-pad only the batch axis (feature axis stays at state_size).  Under
    # jit this pad fuses with the pallas_call input.
    if b_pad == batch:
        x_p = x
    else:
        x_p = jnp.zeros((b_pad, state_size), x.dtype).at[:batch].set(x)

    grid = (num_tiles,)

    # ---- VMEM budgeting: single-buffer large constant weight blocks. ----
    weight_bytes = sum(int(w.size + b.size) * 4 for w, b in padded_params)
    single_buffer_weights = weight_bytes > (2 << 20)
    max_dout = max(int(w.shape[1]) for w, _ in padded_params)
    vmem_est = (2 * tb * state_size * 4            # input tile (double buffered)
                + 2 * tb * dout_pad_last * 4       # output tile (double buffered)
                + 2 * tb * max_dout * 4            # live intermediate activations
                + (1 if single_buffer_weights else 2) * weight_bytes)

    # ---- BlockSpecs ----
    in_specs = [pl.BlockSpec((tb, state_size), lambda i: (i, 0))]
    flat_params = []
    for w, b in padded_params:
        if single_buffer_weights:
            in_specs.append(pl.BlockSpec(w.shape, lambda i: (0, 0),
                                         pipeline_mode=pl.Buffered(1)))
            in_specs.append(pl.BlockSpec(b.shape, lambda i: (0, 0),
                                         pipeline_mode=pl.Buffered(1)))
        else:
            in_specs.append(pl.BlockSpec(w.shape, lambda i: (0, 0)))
            in_specs.append(pl.BlockSpec(b.shape, lambda i: (0, 0)))
        flat_params.extend([w, b])
    out_specs = pl.BlockSpec((tb, dout_pad_last), lambda i: (i, 0))

    compiler_kwargs = dict(dimension_semantics=("parallel",))
    if vmem_est > (24 << 20):
        compiler_kwargs["vmem_limit_bytes"] = min(int(vmem_est * 1.5), 128 << 20)

    # Advisory cost estimate (tells XLA this custom call is tiny).
    flops = sum(2 * b_pad * int(w.shape[0]) * int(w.shape[1])
                for w, _ in padded_params)
    bytes_accessed = x_p.size * 4 + b_pad * dout_pad_last * 4 + weight_bytes

    kernel = functools.partial(_fused_mlp_kernel, num_layers=num_layers)

    out = pl.pallas_call(
        kernel,
        out_shape=jax.ShapeDtypeStruct((b_pad, dout_pad_last), jnp.float32),
        grid=grid,
        in_specs=in_specs,
        out_specs=out_specs,
        compiler_params=pltpu.CompilerParams(**compiler_kwargs),
        cost_estimate=pl.CostEstimate(
            flops=flops, transcendentals=0, bytes_accessed=bytes_accessed
        ),
    )(x_p, *flat_params)

    # Slice away batch/feature padding so downstream argmax over Q-values
    # never sees padded columns.  Fuses with the call under jit.
    return out[:batch, :action_size]


# Jitted entry point: pad + kernel + slice compile into one dispatch.
qnetwork_apply = jax.jit(
    qnetwork_forward,
    static_argnames=("action_size", "block_batch", "min_rows_for_core_split"),
)


def init_qnetwork_params(key, state_size, hidden_size, action_size):
    """Deterministic init mimicking nn.Linear default (uniform +/- 1/sqrt(fan_in)).

    Returns unpadded params [(w [din, dout], b [1, dout]), ...].
    """
    assert isinstance(hidden_size, tuple)
    dims = (state_size,) + hidden_size + (action_size,)
    params = []
    for i in range(len(dims) - 1):
        din, dout = dims[i], dims[i + 1]
        key, kw, kb = jax.random.split(key, 3)
        bound = 1.0 / jnp.sqrt(jnp.float32(din))
        # Weight already transposed to [din, dout] for the kernel.
        w = jax.random.uniform(kw, (din, dout), jnp.float32, -bound, bound)
        b = jax.random.uniform(kb, (1, dout), jnp.float32, -bound, bound)
        params.append((w, b))
    return params


def pad_params(params):
    """Zero-pad feature dims up to multiples of 128 (lane width).

    Layer 0 keeps its din unpadded (the kernel reads the raw state features);
    all dout dims and the din of layers >= 1 are padded.  Zero padding is
    numerically exact: padded input columns meet zero weight rows, padded
    output columns get zero bias (and ReLU(0) == 0), and the next layer's
    padded input rows are zero weights.
    """
    padded = []
    for i, (w, b) in enumerate(params):
        din, dout = w.shape
        din_p = din if i == 0 else _round_up(din, 128)
        dout_p = _round_up(dout, 128)
        w_p = jnp.zeros((din_p, dout_p), w.dtype).at[:din, :dout].set(w)
        b_p = jnp.zeros((1, dout_p), b.dtype).at[:, :dout].set(b)
        padded.append((w_p, b_p))
    return padded


if __name__ == "__main__":
    state_size = 16
    hidden_size = (32, 32)
    action_size = 4
    batch = 2

    key = jax.random.PRNGKey(0)
    key, kx = jax.random.split(key)
    x = jax.random.normal(kx, (batch, state_size), jnp.float32)

    params = init_qnetwork_params(key, state_size, hidden_size, action_size)
    padded = pad_params(params)

    out = qnetwork_apply(x, padded, action_size=action_size)
    out = jax.block_until_ready(out)

    # Pure-JAX reference (unpadded params) for a sanity check.
    ref = x
    for i, (w, b) in enumerate(params):
        ref = ref @ w + b
        if i != len(params) - 1:
            ref = jnp.maximum(ref, 0.0)

    assert out.shape == (batch, action_size)
    assert jnp.allclose(out, ref, atol=1e-5, rtol=1e-5)

    print("KERNEL_OK")
</pallas_src>

<mosaic_0001>
module attributes {stable_mosaic.version = 11 : i64} {
  func.func @_fused_mlp_kernel(%arg0: i32, %arg1: memref<8x16xf32, #tpu.memory_space<vmem>>, %arg2: memref<16x128xf32, #tpu.memory_space<vmem>>, %arg3: memref<1x128xf32, #tpu.memory_space<vmem>>, %arg4: memref<128x128xf32, #tpu.memory_space<vmem>>, %arg5: memref<1x128xf32, #tpu.memory_space<vmem>>, %arg6: memref<128x128xf32, #tpu.memory_space<vmem>>, %arg7: memref<1x128xf32, #tpu.memory_space<vmem>>, %arg8: memref<8x128xf32, #tpu.memory_space<vmem>>) attributes {dimension_semantics = [#tpu.dimension_semantics<parallel>], iteration_bounds = array<i64: 1>, scalar_prefetch = 0 : i64, scratch_operands = 0 : i64, tpu.core_type = #tpu.core_type<tc>, window_params = [{transform_indices = @transform_0, window_bounds = array<i64: 8, 16>}, {pipeline_mode = #tpu.pipeline_mode<synchronous>, transform_indices = @transform_1, window_bounds = array<i64: 16, 128>}, {pipeline_mode = #tpu.pipeline_mode<synchronous>, transform_indices = @transform_2, window_bounds = array<i64: 1, 128>}, {pipeline_mode = #tpu.pipeline_mode<synchronous>, transform_indices = @transform_3, window_bounds = array<i64: 128, 128>}, {pipeline_mode = #tpu.pipeline_mode<synchronous>, transform_indices = @transform_4, window_bounds = array<i64: 1, 128>}, {pipeline_mode = #tpu.pipeline_mode<synchronous>, transform_indices = @transform_5, window_bounds = array<i64: 128, 128>}, {pipeline_mode = #tpu.pipeline_mode<synchronous>, transform_indices = @transform_6, window_bounds = array<i64: 1, 128>}, {transform_indices = @transform_7, window_bounds = array<i64: 8, 128>}]} {
    %c0 = arith.constant 0 : index
    %c0_0 = arith.constant 0 : index
    %0 = vector.load %arg1[%c0, %c0_0] : memref<8x16xf32, #tpu.memory_space<vmem>>, vector<8x16xf32>
    %c0_1 = arith.constant 0 : index
    %c0_2 = arith.constant 0 : index
    %1 = vector.load %arg2[%c0_1, %c0_2] : memref<16x128xf32, #tpu.memory_space<vmem>>, vector<16x128xf32>
    %c0_3 = arith.constant 0 : index
    %c0_4 = arith.constant 0 : index
    %2 = vector.load %arg3[%c0_3, %c0_4] : memref<1x128xf32, #tpu.memory_space<vmem>>, vector<1x128xf32>
    %cst = arith.constant dense<0.000000e+00> : vector<8x128xf32>
    %3 = tpu.matmul %0, %1, %cst {dimension_numbers = #tpu.dot_dimension_numbers<[1], [0], [0], [1], [0, 0, 1, 1], [], []>} : vector<8x16xf32>, vector<16x128xf32>, vector<8x128xf32> -> vector<8x128xf32>
    %4 = vector.broadcast %2 : vector<1x128xf32> to vector<8x128xf32>
    %5 = arith.addf %3, %4 : vector<8x128xf32>
    %cst_5 = arith.constant 0.000000e+00 : f32
    %6 = vector.broadcast %cst_5 : f32 to vector<8x128xf32>
    %7 = arith.maximumf %5, %6 : vector<8x128xf32>
    %c0_6 = arith.constant 0 : index
    %c0_7 = arith.constant 0 : index
    %8 = vector.load %arg4[%c0_6, %c0_7] : memref<128x128xf32, #tpu.memory_space<vmem>>, vector<128x128xf32>
    %c0_8 = arith.constant 0 : index
    %c0_9 = arith.constant 0 : index
    %9 = vector.load %arg5[%c0_8, %c0_9] : memref<1x128xf32, #tpu.memory_space<vmem>>, vector<1x128xf32>
    %cst_10 = arith.constant dense<0.000000e+00> : vector<8x128xf32>
    %10 = tpu.matmul %7, %8, %cst_10 {dimension_numbers = #tpu.dot_dimension_numbers<[1], [0], [0], [1], [0, 0, 1, 1], [], []>} : vector<8x128xf32>, vector<128x128xf32>, vector<8x128xf32> -> vector<8x128xf32>
    %11 = vector.broadcast %9 : vector<1x128xf32> to vector<8x128xf32>
    %12 = arith.addf %10, %11 : vector<8x128xf32>
    %cst_11 = arith.constant 0.000000e+00 : f32
    %13 = vector.broadcast %cst_11 : f32 to vector<8x128xf32>
    %14 = arith.maximumf %12, %13 : vector<8x128xf32>
    %c0_12 = arith.constant 0 : index
    %c0_13 = arith.constant 0 : index
    %15 = vector.load %arg6[%c0_12, %c0_13] : memref<128x128xf32, #tpu.memory_space<vmem>>, vector<128x128xf32>
    %c0_14 = arith.constant 0 : index
    %c0_15 = arith.constant 0 : index
    %16 = vector.load %arg7[%c0_14, %c0_15] : memref<1x128xf32, #tpu.memory_space<vmem>>, vector<1x128xf32>
    %cst_16 = arith.constant dense<0.000000e+00> : vector<8x128xf32>
    %17 = tpu.matmul %14, %15, %cst_16 {dimension_numbers = #tpu.dot_dimension_numbers<[1], [0], [0], [1], [0, 0, 1, 1], [], []>} : vector<8x128xf32>, vector<128x128xf32>, vector<8x128xf32> -> vector<8x128xf32>
    %18 = vector.broadcast %16 : vector<1x128xf32> to vector<8x128xf32>
    %19 = arith.addf %17, %18 : vector<8x128xf32>
    %c0_17 = arith.constant 0 : index
    %c0_18 = arith.constant 0 : index
    %20 = vector.load %arg8[%c0_17, %c0_18] : memref<8x128xf32, #tpu.memory_space<vmem>>, vector<8x128xf32>
    tpu.vector_store %arg8[%c0_17, %c0_18], %19 {strides = array<i32>} : memref<8x128xf32, #tpu.memory_space<vmem>>, vector<8x128xf32>,
    return
  }
  func.func @transform_0(%arg0: i32) -> (i32, i32) {
    %c0_i32 = arith.constant 0 : i32
    %c0_i32_0 = arith.constant 0 : i32
    return %arg0, %c0_i32 : i32, i32
  }
  func.func @transform_1(%arg0: i32) -> (i32, i32) {
    %c0_i32 = arith.constant 0 : i32
    %c0_i32_0 = arith.constant 0 : i32
    %c0_i32_1 = arith.constant 0 : i32
    return %c0_i32, %c0_i32_0 : i32, i32
  }
  func.func @transform_2(%arg0: i32) -> (i32, i32) {
    %c0_i32 = arith.constant 0 : i32
    %c0_i32_0 = arith.constant 0 : i32
    %c0_i32_1 = arith.constant 0 : i32
    return %c0_i32, %c0_i32_0 : i32, i32
  }
  func.func @transform_3(%arg0: i32) -> (i32, i32) {
    %c0_i32 = arith.constant 0 : i32
    %c0_i32_0 = arith.constant 0 : i32
    %c0_i32_1 = arith.constant 0 : i32
    return %c0_i32, %c0_i32_0 : i32, i32
  }
  func.func @transform_4(%arg0: i32) -> (i32, i32) {
    %c0_i32 = arith.constant 0 : i32
    %c0_i32_0 = arith.constant 0 : i32
    %c0_i32_1 = arith.constant 0 : i32
    return %c0_i32, %c0_i32_0 : i32, i32
  }
  func.func @transform_5(%arg0: i32) -> (i32, i32) {
    %c0_i32 = arith.constant 0 : i32
    %c0_i32_0 = arith.constant 0 : i32
    %c0_i32_1 = arith.constant 0 : i32
    return %c0_i32, %c0_i32_0 : i32, i32
  }
  func.func @transform_6(%arg0: i32) -> (i32, i32) {
    %c0_i32 = arith.constant 0 : i32
    %c0_i32_0 = arith.constant 0 : i32
    %c0_i32_1 = arith.constant 0 : i32
    return %c0_i32, %c0_i32_0 : i32, i32
  }
  func.func @transform_7(%arg0: i32) -> (i32, i32) {
    %c0_i32 = arith.constant 0 : i32
    %c0_i32_0 = arith.constant 0 : i32
    return %arg0, %c0_i32 : i32, i32
  }
}

</mosaic_0001>

<bundles_post_ra>
// kernel: qnetwork_forward.1
= control target key start
LH: loop header
LB: loop body
LE: loop exit
PB: predicated region body
PF: predicated region fallthrough
CT: control target
= control target key end

     0   :  { %12 = vsyncpa [#allocation3], 0  ;;  %s728_s0 = inlined_call_operand.vmem [shape: f32[8,16], index: 0, kind: input, shape index: {}]   ;;  %s729_s1 = inlined_call_operand.hbm [shape: f32[16,128], index: 1, kind: input, shape index: {}]   ;;  %s730_s2 = inlined_call_operand.vmem [shape: f32[1,128], index: 2, kind: input, shape index: {}]   ;;  %s731_s3 = inlined_call_operand.hbm [shape: f32[128,128], index: 3, kind: input, shape index: {}]   ;;  %s732_s4 = inlined_call_operand.vmem [shape: f32[1,128], index: 4, kind: input, shape index: {}]   ;;  %s733_s5 = inlined_call_operand.hbm [shape: f32[128,128], index: 5, kind: input, shape index: {}]   ;;  %s734_s6 = inlined_call_operand.vmem [shape: f32[1,128], index: 6, kind: input, shape index: {}]   ;;  %s735_s7 = inlined_call_operand.vmem [shape: f32[8,128], index: 7, kind: output, shape index: {}]  }
   0x1   :  { %13 = vsyncpa [#allocation5], 0  ;;  %s593_s24 = smov [#allocation4]   ;;  %s594_s26 = smov [#allocation2]  }
   0x2   :  { %s35_s25 = sshll.u32 %s593_s24, 4  ;;  %s21_s27 = sshll.u32 %s594_s26, 4  ;;  %s36_s25 = int_to_ptr.vmem [resolvable:$true] %s35_s25  ;;  %s641_s27 = int_to_ptr.vmem [resolvable:$true] %s21_s27 }
   0x3   :  { %s523_s30 = scalar_lea.hbm %s731_s3, 2048 }
   0x4   :  { %p524_p0 = scmp.ne.s32.totalorder %s731_s3, %s523_s30  ;;  %p527_p1 = scmp.lt.u32.totalorder %s523_s30, %s731_s3 }
   0x6   :  { %p529_p2 = pnand %p527_p1, %p524_p0 }
   0x8   :  { %532 = shalt.err (!%p529_p2)
}
   0x9   :  { %s533_s12 = scalar_lea.vmem %s36_s25, 2048  ;;  %p538_p4 = scmp.lt.s32.totalorder %s36_s25, %s36_s25 }
   0xa   :  { %p534_p3 = scmp.ne.s32.totalorder %s36_s25, %s533_s12  ;;  %p539_p5 = scmp.lt.s32.totalorder %s533_s12, %s533_s12 }
   0xc   :  { %p540_p6 = por %p539_p5, %p538_p4 }
   0xe   :  { %p541_p7 = pnand %p540_p6, %p534_p3 }
  0x10   :  { %544 = shalt.err (!%p541_p7)
}
  0x11   :  { %s595_s13 = smov 128   ;;  %s596_s14 = smov 8  }
  0x12   :  { %41 = dma.hbm_to_vmem [thread:$0]  %s731_s3, 2048, %s36_s25, [#allocation5], %s595_s13, %s595_s13, %s596_s14  }
  0x13   :  { %s545_s19 = scalar_lea.hbm %s729_s1, 256 }
  0x14   :  { %p546_p8 = scmp.ne.s32.totalorder %s729_s1, %s545_s19  ;;  %p549_p9 = scmp.lt.u32.totalorder %s545_s19, %s729_s1 }
  0x16   :  { %p551_p10 = pnand %p549_p9, %p546_p8 }
  0x18   :  { %554 = shalt.err (!%p551_p10)
}
  0x19   :  { %s555_s24 = scalar_lea.vmem %s641_s27, 256  ;;  %p560_p12 = scmp.lt.s32.totalorder %s641_s27, %s641_s27 }
  0x1a   :  { %p556_p11 = scmp.ne.s32.totalorder %s641_s27, %s555_s24  ;;  %p561_p13 = scmp.lt.s32.totalorder %s555_s24, %s555_s24 }
  0x1c   :  { %p562_p0 = por %p561_p13, %p560_p12 }
  0x1e   :  { %p563_p1 = pnand %p562_p0, %p556_p11 }
  0x20   :  { %566 = shalt.err (!%p563_p1)
}
  0x21   :  { %27 = dma.hbm_to_vmem [thread:$0]  %s729_s1, 256, %s641_s27, [#allocation3], %s595_s13, %s595_s13, %s596_s14  }
  0x22   :  { %s597_s26 = smov [#allocation6]   ;;  %s567_s8 = scalar_lea.hbm %s733_s5, 2048 }
  0x23   :  { %s49_s28 = sshll.u32 %s597_s26, 4  ;;  %p568_p2 = scmp.ne.s32.totalorder %s733_s5, %s567_s8  ;;  %s50_s28 = int_to_ptr.vmem [resolvable:$true] %s49_s28 }
  0x24   :  { %p571_p3 = scmp.lt.u32.totalorder %s567_s8, %s733_s5 }
  0x26   :  { %p573_p4 = pnand %p571_p3, %p568_p2 }
  0x28   :  { %576 = shalt.err (!%p573_p4)
}
  0x29   :  { %s577_s15 = scalar_lea.vmem %s50_s28, 2048  ;;  %p582_p6 = scmp.lt.s32.totalorder %s50_s28, %s50_s28 }
  0x2a   :  { %p578_p5 = scmp.ne.s32.totalorder %s50_s28, %s577_s15  ;;  %p583_p7 = scmp.lt.s32.totalorder %s577_s15, %s577_s15 }
  0x2c   :  { %p584_p8 = por %p583_p7, %p582_p6 }
  0x2e   :  { %p585_p9 = pnand %p584_p8, %p578_p5 }
  0x30   :  { %588 = shalt.err (!%p585_p9)
}
  0x31   :  { %55 = dma.hbm_to_vmem [thread:$0]  %s733_s5, 2048, %s50_s28, [#allocation5], %s595_s13, %s595_s13, %s596_s14  }
  0x32   :  { %589 = dma.done.wait [#allocation3], 256  }
  0x33   :  { %590 = vsyncadd [#allocation3], 4294967040 }
  0x34   :  { %591 = dma.done.wait [#allocation5], 4096  }
  0x35   :  { %592 = vsyncadd [#allocation5], 4294963200  ;;  %v598_v0 = vmov 0.0|0.0   ;;  %vm599_vm0 = vmmov 0   ;;  %v600_v1 = vmov 0.0   ;;  %v68_v2 = vld [vmem:[#allocation2] sm:$0xff] }
  0x36   :  { %464 = vmatprep.subr.bf16.mxu0 %v598_v0  ;;  %391 = vmatprep.mubr.msk.f32.mxu0 %vm599_vm0, %v600_v1  ;;  %v69_v3 = vld [vmem:[#allocation2 + $0x8] sm:$0xff]  ;;  %v152_v5 = vld [vmem:[#allocation4] sm:$0xff]  ;;  %v153_v6 = vld [vmem:[#allocation4 + $0x8] sm:$0xff]  ;;  %vm77_vm1 = vcmask 130048  }
  0x37   :  { %467 = vmatprep.subr.bf16.mxu1 %v598_v0  ;;  %426 = vmatprep.mubr.msk.f32.mxu1 %vm599_vm0, %v600_v1  ;;  %v465_v4 = vpack.c.bf16 %v69_v3, %v68_v2  ;;  %v154_v7 = vld [vmem:[#allocation4 + $0x10] sm:$0xff]  ;;  %v468_v8 = vpack.c.bf16 %v153_v6, %v152_v5  ;;  %v155_v9 = vld [vmem:[#allocation4 + $0x18] sm:$0xff]  ;;  %v156_v12 = vld [vmem:[#allocation4 + $0x20] sm:$0xff] }
  0x38   :  { %v67_v10 = vld [vmem:[%s728_s0] sm:$0xff]  ;;  %v471_v11 = vpack.c.bf16 %v155_v9, %v154_v7  ;;  %v157_v13 = vld [vmem:[#allocation4 + $0x28] sm:$0xff]  ;;  %v159_v16 = vld [vmem:[#allocation4 + $0x38] sm:$0xff] }
  0x39   :  { %466 = vmatpush3.bf16.msra.mxu0 %v465_v4  ;;  %469 = vmatpush3.bf16.msra.mxu1 %v468_v8  ;;  %v474_v14 = vpack.c.bf16 %v157_v13, %v156_v12  ;;  %v158_v15 = vld [vmem:[#allocation4 + $0x30] sm:$0xff]  ;;  %v160_v18 = vld [vmem:[#allocation4 + $0x40] sm:$0xff]  ;;  %v161_v19 = vld [vmem:[#allocation4 + $0x48] sm:$0xff] }
  0x3a   :  { %491 = vmatprep.subr.bf16.mxu0 %v598_v0  ;;  %470 = vmatprep.subr.bf16.mxu1 %v598_v0  ;;  %v477_v17 = vpack.c.bf16 %v159_v16, %v158_v15  ;;  %v480_v20 = vpack.c.bf16 %v161_v19, %v160_v18  ;;  %v162_v21 = vld [vmem:[#allocation4 + $0x50] sm:$0xff]  ;;  %v163_v22 = vld [vmem:[#allocation4 + $0x58] sm:$0xff]  ;;  %v164_v24 = vld [vmem:[#allocation4 + $0x60] sm:$0xff] }
  0x3b   :  { %v483_v23 = vpack.c.bf16 %v163_v22, %v162_v21  ;;  %v165_v25 = vld [vmem:[#allocation4 + $0x68] sm:$0xff]  ;;  %v166_v27 = vld [vmem:[#allocation4 + $0x70] sm:$0xff]  ;;  %v167_v28 = vld [vmem:[#allocation4 + $0x78] sm:$0xff] }
  0x3c   :  { %392 = vmatmul.mubr.msk.f32.vlgmr.msra.gmra.mrb[0].mxu0 %vm77_vm1, %v67_v10  ;;  %v486_v26 = vpack.c.bf16 %v165_v25, %v164_v24  ;;  %v489_v29 = vpack.c.bf16 %v167_v28, %v166_v27  ;;  %v246_v30 = vld [vmem:[#allocation6] sm:$0xff]  ;;  %v247_v31 = vld [vmem:[#allocation6 + $0x8] sm:$0xff]  ;;  %v248_v32 = vld [vmem:[#allocation6 + $0x10] sm:$0xff] }
  0x3d   :  { %461 = vmatprep.mubr.msk.f32.mxu0 %vm599_vm0, %v600_v1  ;;  %472 = vmatpush3.bf16.msra.mxu1 %v471_v11  ;;  %v492_v33 = vpack.c.bf16 %v247_v31, %v246_v30  ;;  %v249_v34 = vld [vmem:[#allocation6 + $0x18] sm:$0xff]  ;;  %v250_v36 = vld [vmem:[#allocation6 + $0x20] sm:$0xff]  ;;  %v251_v37 = vld [vmem:[#allocation6 + $0x28] sm:$0xff] }
  0x3e   :  { %473 = vmatprep.subr.bf16.mxu1 %v598_v0  ;;  %v495_v35 = vpack.c.bf16 %v249_v34, %v248_v32  ;;  %v498_v38 = vpack.c.bf16 %v251_v37, %v250_v36  ;;  %v252_v39 = vld [vmem:[#allocation6 + $0x30] sm:$0xff]  ;;  %v253_v40 = vld [vmem:[#allocation6 + $0x38] sm:$0xff]  ;;  %v254_v42 = vld [vmem:[#allocation6 + $0x40] sm:$0xff] }
  0x3f   :  { %493 = vmatpush3.bf16.msra.mxu0 %v492_v33  ;;  %v501_v41 = vpack.c.bf16 %v253_v40, %v252_v39  ;;  %v255_v43 = vld [vmem:[#allocation6 + $0x48] sm:$0xff]  ;;  %v256_v45 = vld [vmem:[#allocation6 + $0x50] sm:$0xff]  ;;  %v257_v46 = vld [vmem:[#allocation6 + $0x58] sm:$0xff] }
  0x40   :  { %494 = vmatprep.subr.bf16.mxu0 %v598_v0  ;;  %v504_v44 = vpack.c.bf16 %v255_v43, %v254_v42  ;;  %v507_v47 = vpack.c.bf16 %v257_v46, %v256_v45  ;;  %v258_v48 = vld [vmem:[#allocation6 + $0x60] sm:$0xff]  ;;  %v259_v49 = vld [vmem:[#allocation6 + $0x68] sm:$0xff]  ;;  %v346_v51 = vld [vmem:[%s730_s2] ss:$0 sm:$0xff] }
  0x41   :  { %475 = vmatpush3.bf16.msra.mxu1 %v474_v14  ;;  %v510_v50 = vpack.c.bf16 %v259_v49, %v258_v48  ;;  %v260_v56 = vld [vmem:[#allocation6 + $0x70] sm:$0xff]  ;;  %v261_v57 = vld [vmem:[#allocation6 + $0x78] sm:$0xff] }
  0x42   :  { %476 = vmatprep.subr.bf16.mxu1 %v598_v0  ;;  %v513_v58 = vpack.c.bf16 %v261_v57, %v260_v56  ;;  %v348_v59 = vld [vmem:[%s732_s4] ss:$0 sm:$0xff] }
  0x43   :  { %496 = vmatpush3.bf16.msra.mxu0 %v495_v35 }
  0x44   :  { %497 = vmatprep.subr.bf16.mxu0 %v598_v0 }
  0x45   :  { %478 = vmatpush3.bf16.msra.mxu1 %v477_v17 }
  0x46   :  { %479 = vmatprep.subr.bf16.mxu1 %v598_v0 }
  0x47   :  { %499 = vmatpush3.bf16.msra.mxu0 %v498_v38 }
  0x48   :  { %500 = vmatprep.subr.bf16.mxu0 %v598_v0 }
  0x49   :  { %481 = vmatpush3.bf16.msra.mxu1 %v480_v20 }
  0x4a   :  { %482 = vmatprep.subr.bf16.mxu1 %v598_v0 }
  0x4b   :  { %502 = vmatpush3.bf16.msra.mxu0 %v501_v41 }
  0x4c   :  { %503 = vmatprep.subr.bf16.mxu0 %v598_v0 }
  0x4d   :  { %484 = vmatpush3.bf16.msra.mxu1 %v483_v23 }
  0x4e   :  { %485 = vmatprep.subr.bf16.mxu1 %v598_v0 }
  0x4f   :  { %505 = vmatpush3.bf16.msra.mxu0 %v504_v44 }
  0x50   :  { %506 = vmatprep.subr.bf16.mxu0 %v598_v0 }
  0x51   :  { %487 = vmatpush3.bf16.msra.mxu1 %v486_v26 }
  0x52   :  { %488 = vmatprep.subr.bf16.mxu1 %v598_v0 }
  0x53   :  { %508 = vmatpush3.bf16.msra.mxu0 %v507_v47 }
  0x54   :  { %509 = vmatprep.subr.bf16.mxu0 %v598_v0 }
  0x55   :  { %490 = vmatpush3.bf16.msra.mxu1 %v489_v29 }
  0x57   :  { %511 = vmatpush3.bf16.msra.mxu0 %v510_v50 }
  0x58   :  { %512 = vmatprep.subr.bf16.mxu0 %v598_v0  ;;  %v349_v0 = vld [vmem:[%s734_s6] ss:$0 sm:$0xff] }
  0x5b   :  { %514 = vmatpush3.bf16.msra.mxu0 %v513_v58 }
 0x10f   :  { %v147_v52 = vpop.f32.mrb[0].mxu0 }
 0x110   :  { %v148_v53 = vadd.f32 %v346_v51, %v147_v52  ;;  %v393_v54 = vpop.f32.mrb[1].mxu0 }
 0x112   :  { %v151_v55 = vmax.f32 %v148_v53, 0.0 }
 0x114   :  { %427 = vmatmul.mubr.f32.vlgmr.msra.gmra.mrb[0].mxu1 %v151_v55 }
 0x1e7   :  { %v241_v60 = vpop.f32.mrb[0].mxu1 }
 0x1e8   :  { %v242_v61 = vadd.f32 %v348_v59, %v241_v60  ;;  %v428_v62 = vpop.f32.mrb[1].mxu1 }
 0x1ea   :  { %v245_v63 = vmax.f32 %v242_v61, 0.0 }
 0x1ec   :  { %462 = vmatmul.mubr.f32.vlgmr.msra.gmra.mrb[2].mxu0 %v245_v63 }
 0x2bf   :  { %v335_v1 = vpop.f32.mrb[2].mxu0 }
 0x2c0   :  { %v336_v2 = vadd.f32 %v349_v0, %v335_v1  ;;  %v463_v3 = vpop.f32.mrb[3].mxu0 }
 0x2c2   :  { %339 = vst [vmem:[%s735_s7] sm:$0xff] %v336_v2 }
 0x2c3   :  { %344 = vsyncpa [#allocation3], 1 }
 0x2c4   :  { %345 = vsyncpa [#allocation5], 1 }

</bundles_post_ra>
